<compile_context>
chip_gen: v5e
topology: v5e:2x2
jax: 0.10.0
libtpu: 0.0.40
codegen_flags: <defaults>
</compile_context>

<pallas_src>
import jax
import jax.numpy as jnp
from jax.experimental import pallas as pl
from jax.experimental.pallas import tpu as pltpu


def _maxnn_kernel(w_ref, b_ref, x_ref, o_ref):
    """Fused two-branch Linear(2,2) + elementwise max, lane-packed layout.

    w_ref : SMEM (4, 2)   rows 0-1 = fc1 weights, rows 2-3 = fc2 weights (out, in)
    b_ref : SMEM (4,)     fc1 biases then fc2 biases
    x_ref : VMEM (TS,128) flattened x; even lanes hold feature 0, odd lanes feature 1
    o_ref : VMEM (TS,128) flattened y; same lane packing (even = out 0, odd = out 1)
    """
    x = x_ref[...].astype(jnp.float32)
    ts, lanes = x.shape

    lane = jax.lax.broadcasted_iota(jnp.int32, (ts, lanes), 1)
    even = (lane % 2) == 0  # even lane -> feature/output index 0, odd -> index 1

    # Pair each lane with its (feature 0, feature 1) partner via XLU lane rotations.
    # Pairs (2b, 2b+1) never straddle the 128-lane boundary, and the circular wrap
    # lanes (0 / 127) are never selected by the parity mask, so no masking needed.
    x_prev = pltpu.roll(x, shift=1, axis=1)          # out[l] = x[l-1]
    x_next = pltpu.roll(x, shift=lanes - 1, axis=1)  # out[l] = x[l+1]
    x0 = jnp.where(even, x, x_prev)                  # feature 0 of this lane's batch row
    x1 = jnp.where(even, x_next, x)                  # feature 1 of this lane's batch row

    # Lane-parity weight/bias vectors: output index j = lane % 2.
    wa0 = jnp.where(even, w_ref[0, 0], w_ref[1, 0])  # fc1 weight on feature 0
    wa1 = jnp.where(even, w_ref[0, 1], w_ref[1, 1])  # fc1 weight on feature 1
    ba = jnp.where(even, b_ref[0], b_ref[1])
    wb0 = jnp.where(even, w_ref[2, 0], w_ref[3, 0])  # fc2 weight on feature 0
    wb1 = jnp.where(even, w_ref[2, 1], w_ref[3, 1])  # fc2 weight on feature 1
    bb = jnp.where(even, b_ref[2], b_ref[3])

    y1 = wa0 * x0 + wa1 * x1 + ba                    # fc1 branch
    y2 = wb0 * x0 + wb1 * x1 + bb                    # fc2 branch
    o_ref[...] = jnp.maximum(y1, y2).astype(o_ref.dtype)   # single direct store


def _maxnn_xla(x2d, w1, b1, w2, b2):
    """Plain XLA fallback for tiny or oddly-shaped batches."""
    xf = x2d.astype(jnp.float32)
    y = jnp.maximum(xf @ w1.astype(jnp.float32).T + b1.astype(jnp.float32),
                    xf @ w2.astype(jnp.float32).T + b2.astype(jnp.float32))
    return y.astype(x2d.dtype)


def maxnn_forward(x, w1, b1, w2, b2, *, block_rows=4096, force_kernel=False,
                  min_elems_for_kernel=1 << 16, core_parallel=False):
    """y = max(x.flatten(1) @ W1^T + b1, x.flatten(1) @ W2^T + b2).

    x          : any shape whose flatten(1) gives (B, 2)
    w1, w2     : PyTorch Linear layout (2, 2);  b1, b2: (2,)
    block_rows : rows of 128 lanes per tile; 4096 rows ~= 2 MiB/buffer of f32.
                 Raise (e.g. 8192-16384) on v7x's 3.2 TB/s HBM, fits VMEM easily.
    core_parallel : set True on v7x to split the batch grid axis across both
                 TensorCores (pltpu.CORE_PARALLEL).
    """
    x2d = x.reshape(x.shape[0], -1)
    batch, in_f = x2d.shape
    out_f, in_w = w1.shape
    if in_f != in_w:
        raise ValueError(f"flatten(1) yields {in_f} features but weights expect {in_w}")
    if w2.shape != (out_f, in_w) or b1.shape != (out_f,) or b2.shape != (out_f,):
        raise ValueError("inconsistent weight/bias shapes")

    n_elems = batch * in_f
    kernel_capable = (in_f == 2 and out_f == 2 and n_elems % 128 == 0)
    if not kernel_capable or (not force_kernel and n_elems < min_elems_for_kernel):
        # Below ~64K elements (or non-128-divisible flat length) the pallas_call
        # dispatch alone exceeds the op's entire HBM time — let XLA fuse it.
        return _maxnn_xla(x2d, w1, b1, w2, b2)

    # Free, contiguous relayout: (B, 2) viewed as (R, 128) lane-packed rows.
    rows = n_elems // 128
    x_lanes = x2d.reshape(rows, 128)

    # Tile: full-array block if it fits, else a multiple-of-8 row block with a
    # clipped partial edge block (no jnp.pad, no extra HBM pass).
    ts = min(block_rows, rows)
    if ts < rows:
        ts = max(8, (ts // 8) * 8)
    grid = (pl.cdiv(rows, ts),)

    # Fuse both branches into one SMEM scalar table (single pass over x).
    w = jnp.concatenate([w1, w2], axis=0).astype(jnp.float32)   # (4, 2)
    b = jnp.concatenate([b1, b2], axis=0).astype(jnp.float32)   # (4,)

    sem = pltpu.CORE_PARALLEL if core_parallel else "parallel"  # CORE_PARALLEL: v7x

    y_lanes = pl.pallas_call(
        _maxnn_kernel,
        out_shape=jax.ShapeDtypeStruct((rows, 128), x2d.dtype),
        grid=grid,
        in_specs=[
            pl.BlockSpec(memory_space=pltpu.MemorySpace.SMEM),   # fused weights
            pl.BlockSpec(memory_space=pltpu.MemorySpace.SMEM),   # fused biases
            pl.BlockSpec((ts, 128), lambda i: (i, 0)),           # x lane-packed tile
        ],
        out_specs=pl.BlockSpec((ts, 128), lambda i: (i, 0)),     # y lane-packed tile
        compiler_params=pltpu.CompilerParams(dimension_semantics=(sem,)),
    )(w, b, x_lanes)

    # Free contiguous view back to (B, OUT): lane packing == row-major (B, 2).
    return y_lanes.reshape(batch, out_f)


if __name__ == "__main__":
    key = jax.random.PRNGKey(0)
    kx, k1w, k1b, k2w, k2b, kx2 = jax.random.split(key, 6)

    B, IN, OUT = 256, 2, 2  # fc1/fc2 are Linear(2, 2); flatten(1) -> 2 features

    # NCHW-style input that flattens to 2 features, matching the PyTorch module.
    x = jax.random.normal(kx, (B, IN, 1, 1), dtype=jnp.float32)

    # Deterministic PyTorch-style init: U(-1/sqrt(in), 1/sqrt(in)), weight (out, in).
    bound = 1.0 / jnp.sqrt(jnp.float32(IN))
    w1 = jax.random.uniform(k1w, (OUT, IN), jnp.float32, -bound, bound)
    b1 = jax.random.uniform(k1b, (OUT,), jnp.float32, -bound, bound)
    w2 = jax.random.uniform(k2w, (OUT, IN), jnp.float32, -bound, bound)
    b2 = jax.random.uniform(k2b, (OUT,), jnp.float32, -bound, bound)

    # Force the Pallas kernel path for the demo (the dispatcher would route this
    # tiny batch to the XLA fallback otherwise).
    y = maxnn_forward(x, w1, b1, w2, b2, force_kernel=True)
    jax.block_until_ready(y)

    # Reference check in plain JAX (same math as the PyTorch module).
    x2d = x.reshape(B, -1)
    y_ref = jnp.maximum(x2d @ w1.T + b1, x2d @ w2.T + b2)
    assert y.shape == (B, OUT)
    assert jnp.allclose(y, y_ref, atol=1e-5, rtol=1e-5)

    # Also exercise the small/odd-batch XLA bypass (B=10 -> not 128-divisible).
    x_small = jax.random.normal(kx2, (10, IN), dtype=jnp.float32)
    y_small = maxnn_forward(x_small, w1, b1, w2, b2)
    y_small_ref = jnp.maximum(x_small @ w1.T + b1, x_small @ w2.T + b2)
    assert jnp.allclose(y_small, y_small_ref, atol=1e-5, rtol=1e-5)

    print("KERNEL_OK")
</pallas_src>

<mosaic_0001>
module attributes {stable_mosaic.version = 11 : i64} {
  func.func @_maxnn_kernel(%arg0: i32, %arg1: memref<4x2xf32, #tpu.memory_space<smem>>, %arg2: memref<4xf32, #tpu.memory_space<smem>>, %arg3: memref<4x128xf32, #tpu.memory_space<vmem>>, %arg4: memref<4x128xf32, #tpu.memory_space<vmem>>) attributes {dimension_semantics = [#tpu.dimension_semantics<parallel>], iteration_bounds = array<i64: 1>, scalar_prefetch = 0 : i64, scratch_operands = 0 : i64, tpu.core_type = #tpu.core_type<tc>, window_params = [{transform_indices = @transform_0, window_bounds = array<i64: 4, 2>}, {transform_indices = @transform_1, window_bounds = array<i64: 4>}, {transform_indices = @transform_2, window_bounds = array<i64: 4, 128>}, {transform_indices = @transform_3, window_bounds = array<i64: 4, 128>}]} {
    %c0 = arith.constant 0 : index
    %c0_0 = arith.constant 0 : index
    %0 = vector.load %arg3[%c0, %c0_0] : memref<4x128xf32, #tpu.memory_space<vmem>>, vector<4x128xf32>
    %1 = tpu.iota {dimensions = array<i32: 1>} : vector<4x128xi32>
    %c2_i32 = arith.constant 2 : i32
    %c0_i32 = arith.constant 0 : i32
    %2 = arith.cmpi eq, %c2_i32, %c0_i32 : i32
    %c1_i32 = arith.constant 1 : i32
    %3 = arith.select %2, %c1_i32, %c2_i32 : i32
    %4 = vector.broadcast %3 : i32 to vector<4x128xi32>
    %5 = arith.remsi %1, %4 : vector<4x128xi32>
    %c0_i32_1 = arith.constant 0 : i32
    %6 = vector.broadcast %c0_i32_1 : i32 to vector<4x128xi32>
    %7 = arith.cmpi ne, %5, %6 : vector<4x128xi32>
    %c0_i32_2 = arith.constant 0 : i32
    %8 = vector.broadcast %c0_i32_2 : i32 to vector<4x128xi32>
    %9 = arith.cmpi slt, %5, %8 : vector<4x128xi32>
    %c0_i32_3 = arith.constant 0 : i32
    %10 = arith.cmpi slt, %3, %c0_i32_3 : i32
    %11 = vector.broadcast %10 : i1 to vector<4x128xi1>
    %12 = vector.broadcast %11 : vector<4x128xi1> to vector<4x128xi1>
    %13 = arith.xori %9, %12 : vector<4x128xi1>
    %14 = arith.andi %13, %7 : vector<4x128xi1>
    %15 = vector.broadcast %3 : i32 to vector<4x128xi32>
    %16 = arith.addi %5, %15 : vector<4x128xi32>
    %17 = arith.select %14, %16, %5 : vector<4x128xi1>, vector<4x128xi32>
    %c0_i32_4 = arith.constant 0 : i32
    %18 = vector.broadcast %c0_i32_4 : i32 to vector<4x128xi32>
    %19 = arith.cmpi eq, %17, %18 : vector<4x128xi32>
    %c1_i32_5 = arith.constant 1 : i32
    %20 = tpu.dynamic_rotate %0 by %c1_i32_5 dim 1 : vector<4x128xf32>, i32 -> vector<4x128xf32>
    %c127_i32 = arith.constant 127 : i32
    %21 = tpu.dynamic_rotate %0 by %c127_i32 dim 1 : vector<4x128xf32>, i32 -> vector<4x128xf32>
    %22 = arith.select %19, %0, %20 : vector<4x128xi1>, vector<4x128xf32>
    %23 = arith.select %19, %21, %0 : vector<4x128xi1>, vector<4x128xf32>
    %c0_6 = arith.constant 0 : index
    %c0_7 = arith.constant 0 : index
    %24 = memref.load %arg1[%c0_6, %c0_7] : memref<4x2xf32, #tpu.memory_space<smem>>
    %c1 = arith.constant 1 : index
    %c0_8 = arith.constant 0 : index
    %25 = memref.load %arg1[%c1, %c0_8] : memref<4x2xf32, #tpu.memory_space<smem>>
    %26 = vector.broadcast %24 : f32 to vector<4x128xf32>
    %27 = vector.broadcast %25 : f32 to vector<4x128xf32>
    %28 = arith.select %19, %26, %27 : vector<4x128xi1>, vector<4x128xf32>
    %c0_9 = arith.constant 0 : index
    %c1_10 = arith.constant 1 : index
    %29 = memref.load %arg1[%c0_9, %c1_10] : memref<4x2xf32, #tpu.memory_space<smem>>
    %c1_11 = arith.constant 1 : index
    %c1_12 = arith.constant 1 : index
    %30 = memref.load %arg1[%c1_11, %c1_12] : memref<4x2xf32, #tpu.memory_space<smem>>
    %31 = vector.broadcast %29 : f32 to vector<4x128xf32>
    %32 = vector.broadcast %30 : f32 to vector<4x128xf32>
    %33 = arith.select %19, %31, %32 : vector<4x128xi1>, vector<4x128xf32>
    %c0_13 = arith.constant 0 : index
    %34 = memref.load %arg2[%c0_13] : memref<4xf32, #tpu.memory_space<smem>>
    %c1_14 = arith.constant 1 : index
    %35 = memref.load %arg2[%c1_14] : memref<4xf32, #tpu.memory_space<smem>>
    %36 = vector.broadcast %34 : f32 to vector<4x128xf32>
    %37 = vector.broadcast %35 : f32 to vector<4x128xf32>
    %38 = arith.select %19, %36, %37 : vector<4x128xi1>, vector<4x128xf32>
    %c2 = arith.constant 2 : index
    %c0_15 = arith.constant 0 : index
    %39 = memref.load %arg1[%c2, %c0_15] : memref<4x2xf32, #tpu.memory_space<smem>>
    %c3 = arith.constant 3 : index
    %c0_16 = arith.constant 0 : index
    %40 = memref.load %arg1[%c3, %c0_16] : memref<4x2xf32, #tpu.memory_space<smem>>
    %41 = vector.broadcast %39 : f32 to vector<4x128xf32>
    %42 = vector.broadcast %40 : f32 to vector<4x128xf32>
    %43 = arith.select %19, %41, %42 : vector<4x128xi1>, vector<4x128xf32>
    %c2_17 = arith.constant 2 : index
    %c1_18 = arith.constant 1 : index
    %44 = memref.load %arg1[%c2_17, %c1_18] : memref<4x2xf32, #tpu.memory_space<smem>>
    %c3_19 = arith.constant 3 : index
    %c1_20 = arith.constant 1 : index
    %45 = memref.load %arg1[%c3_19, %c1_20] : memref<4x2xf32, #tpu.memory_space<smem>>
    %46 = vector.broadcast %44 : f32 to vector<4x128xf32>
    %47 = vector.broadcast %45 : f32 to vector<4x128xf32>
    %48 = arith.select %19, %46, %47 : vector<4x128xi1>, vector<4x128xf32>
    %c2_21 = arith.constant 2 : index
    %49 = memref.load %arg2[%c2_21] : memref<4xf32, #tpu.memory_space<smem>>
    %c3_22 = arith.constant 3 : index
    %50 = memref.load %arg2[%c3_22] : memref<4xf32, #tpu.memory_space<smem>>
    %51 = vector.broadcast %49 : f32 to vector<4x128xf32>
    %52 = vector.broadcast %50 : f32 to vector<4x128xf32>
    %53 = arith.select %19, %51, %52 : vector<4x128xi1>, vector<4x128xf32>
    %54 = arith.mulf %28, %22 : vector<4x128xf32>
    %55 = arith.mulf %33, %23 : vector<4x128xf32>
    %56 = arith.addf %54, %55 : vector<4x128xf32>
    %57 = arith.addf %56, %38 : vector<4x128xf32>
    %58 = arith.mulf %43, %22 : vector<4x128xf32>
    %59 = arith.mulf %48, %23 : vector<4x128xf32>
    %60 = arith.addf %58, %59 : vector<4x128xf32>
    %61 = arith.addf %60, %53 : vector<4x128xf32>
    %62 = arith.maximumf %57, %61 : vector<4x128xf32>
    %c0_23 = arith.constant 0 : index
    %c0_24 = arith.constant 0 : index
    %63 = vector.load %arg4[%c0_23, %c0_24] : memref<4x128xf32, #tpu.memory_space<vmem>>, vector<4x128xf32>
    tpu.vector_store %arg4[%c0_23, %c0_24], %62 {strides = array<i32>} : memref<4x128xf32, #tpu.memory_space<vmem>>, vector<4x128xf32>,
    return
  }
  func.func @transform_0(%arg0: i32) -> (i32, i32) {
    %c0_i32 = arith.constant 0 : i32
    %c0_i32_0 = arith.constant 0 : i32
    %c0_i32_1 = arith.constant 0 : i32
    return %c0_i32, %c0_i32_0 : i32, i32
  }
  func.func @transform_1(%arg0: i32) -> i32 {
    %c0_i32 = arith.constant 0 : i32
    %c0_i32_0 = arith.constant 0 : i32
    return %c0_i32 : i32
  }
  func.func @transform_2(%arg0: i32) -> (i32, i32) {
    %c0_i32 = arith.constant 0 : i32
    %c0_i32_0 = arith.constant 0 : i32
    return %arg0, %c0_i32 : i32, i32
  }
  func.func @transform_3(%arg0: i32) -> (i32, i32) {
    %c0_i32 = arith.constant 0 : i32
    %c0_i32_0 = arith.constant 0 : i32
    return %arg0, %c0_i32 : i32, i32
  }
}

</mosaic_0001>

<bundles_post_ra>
// kernel: tpu_custom_call.1
= control target key start
LH: loop header
LB: loop body
LE: loop exit
PB: predicated region body
PF: predicated region fallthrough
CT: control target
= control target key end

     0   :  { %8 = vsyncpa [#allocation4], 0  ;;  %s246_s0 = inlined_call_operand.vmem [shape: f32[4,2], index: 0, kind: input, shape index: {}]   ;;  %s247_s1 = inlined_call_operand.vmem [shape: f32[4], index: 1, kind: input, shape index: {}]   ;;  %s248_s2 = inlined_call_operand.vmem [shape: f32[4,128], index: 2, kind: input, shape index: {}]   ;;  %s249_s3 = inlined_call_operand.hbm [shape: f32[4,128], index: 3, kind: output, shape index: {}]  }
   0x1   :  { %9 = vsyncpa [#allocation6], 0 }
   0x2   :  { %10 = vsyncpa [#allocation3], 0  ;;  %s16_s14 = sshll.u32 %s246_s0, 4  ;;  %s25_s17 = sshll.u32 %s247_s1, 4  ;;  %s17_s14 = int_to_ptr.vmem [resolvable:$true] %s16_s14  ;;  %s26_s17 = int_to_ptr.vmem [resolvable:$true] %s25_s17 }
   0x3   :  { %s189_s18 = smov [#allocation2]   ;;  %s190_s19 = smov [#allocation5]  }
   0x4   :  { %19 = dma.vmem_to_smem %s17_s14, 64, %s189_s18, [#allocation4]  }
   0x5   :  { %28 = dma.vmem_to_smem %s26_s17, 16, %s190_s19, [#allocation6]  }
   0x6   :  { %183 = dma.done.wait [#allocation4], 64  }
   0x7   :  { %184 = vsyncadd [#allocation4], 4294967232 }
   0x8   :  { %185 = dma.done.wait [#allocation6], 16  }
   0x9   :  { %186 = vsyncadd [#allocation6], 4294967280 }
   0xa   :  { %39 = sfence }
   0xb   :  { %v40_v0 = vld [vmem:[%s248_s2] sm:$0xf]  ;;  %s191_s0 = smov 1   ;;  %s192_s22 = smov 127   ;;  %v41_v1 = vlaneseq }
   0xc   :  { %56 = vrot.lane.b32.xlu0 %v40_v0, %s191_s0  ;;  %s62_s23 = sld [smem:[#allocation2]]  ;;  %s193_s6 = smov [#allocation7]  }
   0xd   :  { %s120_s1 = sld [smem:[#allocation2 + $0x80]]  ;;  %v42_v2 = vand.u32 127, %v41_v1  ;;  %s107_s7 = sshll.u32 %s193_s6, 4  ;;  %s108_s7 = int_to_ptr.vmem [resolvable:$true] %s107_s7 }
   0xe   :  { %s124_s24 = sld [smem:[#allocation2 + $0x100]]  ;;  %s109_s10 = sshll.u32 %s249_s3, 4  ;;  %s110_s10 = int_to_ptr.hbm [resolvable:$true] %s109_s10 }
   0xf   :  { %s125_s25 = sld [smem:[#allocation2 + $0x180]]  ;;  %v47_v3 = vand.u32 1, %v42_v2 }
  0x10   :  { %s121_s26 = sld [smem:[#allocation2 + $0x1]] }
  0x11   :  { %s122_s27 = sld [smem:[#allocation2 + $0x81]]  ;;  %vm223_vm0 = vcmp.eq.s32.totalorder %v47_v3, 0 }
  0x12   :  { %s126_s28 = sld [smem:[#allocation2 + $0x101]]  ;;  %v64_v6 = vstv %s62_s23 }
  0x13   :  { %s127_s29 = sld [smem:[#allocation2 + $0x181]]  ;;  %v65_v7 = vstv %s120_s1 }
  0x14   :  { %58 = vrot.lane.b32.xlu0 %v40_v0, %s192_s22  ;;  %s72_s30 = sld [smem:[#allocation5]]  ;;  %v79_v8 = vstv %s124_s24  ;;  %v66_v14 = vsel %vm223_vm0, %v64_v6, %v65_v7 }
  0x15   :  { %s123_s4 = sld [smem:[#allocation5 + $0x1]]  ;;  %v80_v9 = vstv %s125_s25 }
  0x16   :  { %s128_s5 = sld [smem:[#allocation5 + $0x2]]  ;;  %v69_v10 = vstv %s121_s26  ;;  %v81_v15 = vsel %vm223_vm0, %v79_v8, %v80_v9 }
  0x17   :  { %s129_s2 = sld [smem:[#allocation5 + $0x3]]  ;;  %v70_v11 = vstv %s122_s27 }
  0x18   :  { %v84_v12 = vstv %s126_s28  ;;  %v71_v17 = vsel %vm223_vm0, %v69_v10, %v70_v11 }
  0x19   :  { %v85_v13 = vstv %s127_s29 }
  0x1a   :  { %v86_v18 = vsel %vm223_vm0, %v84_v12, %v85_v13  ;;  %v74_v20 = vstv %s72_s30 }
  0x1b   :  { %v75_v21 = vstv %s123_s4 }
  0x1c   :  { %v89_v22 = vstv %s128_s5  ;;  %v76_v29 = vsel %vm223_vm0, %v74_v20, %v75_v21 }
  0x1d   :  { %v90_v23 = vstv %s129_s2 }
  0x1e   :  { %v91_v30 = vsel %vm223_vm0, %v89_v22, %v90_v23 }
  0x7e   :  { %v57_v4 = vpop.permute.xlu0 %56 }
  0x7f   :  { %v60_v16 = vsel %vm223_vm0, %v40_v0, %v57_v4 }
  0x80   :  { %v92_v25 = vmul.f32 %v66_v14, %v60_v16  ;;  %v96_v26 = vmul.f32 %v81_v15, %v60_v16 }
  0x86   :  { %v59_v19 = vpop.permute.xlu0 %58 }
  0x87   :  { %v61_v24 = vsel %vm223_vm0, %v59_v19, %v40_v0 }
  0x88   :  { %v93_v27 = vmul.f32 %v71_v17, %v61_v24  ;;  %v97_v28 = vmul.f32 %v86_v18, %v61_v24 }
  0x8a   :  { %v94_v31 = vadd.f32 %v93_v27, %v92_v25  ;;  %v98_v32 = vadd.f32 %v97_v28, %v96_v26 }
  0x8c   :  { %v95_v33 = vadd.f32 %v94_v31, %v76_v29  ;;  %v99_v34 = vadd.f32 %v98_v32, %v91_v30 }
  0x8e   :  { %v100_v35 = vmax.f32 %v95_v33, %v99_v34 }
  0x90   :  { %101 = vst [vmem:[#allocation7] sm:$0xf] %v100_v35 }
  0x91   :  { %112 = dma.vmem_to_hbm [thread:$0]  %s108_s7, 64, %s110_s10, [#allocation3]  }
  0x92   :  { %187 = dma.done.wait [#allocation3], 64  }
  0x93   :  { %188 = vsyncadd [#allocation3], 4294967232 }
  0x94   :  { %117 = vsyncpa [#allocation3], 1 }
  0x95   :  { %118 = vsyncpa [#allocation4], 1 }
  0x96   :  { %119 = vsyncpa [#allocation6], 1 }

</bundles_post_ra>
